<compile_context>
chip_gen: v7x
topology: tpu7x:2x2x1
jax: 0.10.0
libtpu: 0.0.40
codegen_flags: <defaults>
</compile_context>

<pallas_src>
import functools

import jax
import jax.numpy as jnp
from jax.experimental import pallas as pl
from jax.experimental.pallas import tpu as pltpu

NEG_SLOPE = 0.01   # nn.LeakyReLU(negative_slope=0.01)
BN_EPS = 1e-5      # nn.BatchNorm1d(eps=1e-5)
IN_DIM = 310
IN_PAD = 384       # lane-dense padded input width (multiple of 128)
H1, H2, H3 = 256, 128, 64
OUT_DIM = 4
OUT_PAD = 128      # lane-dense padded output width


def _leaky_relu(x):
    return jnp.where(x > 0, x, NEG_SLOPE * x)


def _round_up(n, m):
    return ((n + m - 1) // m) * m


def mlp_kernel(x_ref, w1_ref, bns_ref, bnb_ref,
               w2_ref, b2_ref, w3_ref, b3_ref, w4_ref, b4_ref, out_ref):
    # Layer 1: Linear(310->256) with bias folded into BN shift, then
    # eval-mode BatchNorm1d(256) as scale*h + shift, then LeakyReLU.
    h = jnp.dot(x_ref[...], w1_ref[...], preferred_element_type=jnp.float32)
    h = _leaky_relu(h * bns_ref[...] + bnb_ref[...])

    # Layer 2: Linear(256, 128) + LeakyReLU
    h = jnp.dot(h.astype(jnp.bfloat16), w2_ref[...],
                preferred_element_type=jnp.float32) + b2_ref[...]
    h = _leaky_relu(h)

    # Layer 3: Linear(128, 64) + LeakyReLU
    h = jnp.dot(h.astype(jnp.bfloat16), w3_ref[...],
                preferred_element_type=jnp.float32) + b3_ref[...]
    h = _leaky_relu(h)

    # Layer 4: Linear(64, 4), padded to 128 lanes -> unmasked lane-dense store.
    out_ref[...] = jnp.dot(h.astype(jnp.bfloat16), w4_ref[...],
                           preferred_element_type=jnp.float32) + b4_ref[...]


@functools.partial(jax.jit, static_argnames=("block_b",))
def mlp_forward(x, params, *, block_b=512):
    """Fused forward pass. x: [B, 310] f32. Returns [B, 4] f32."""
    B = x.shape[0]
    (w1, b1, bn_gamma, bn_beta, bn_mean, bn_var,
     w2, b2, w3, b3, w4, b4) = params

    # Fold eval-mode BatchNorm (and the layer-1 bias) into scale + shift.
    bn_scale = (bn_gamma / jnp.sqrt(bn_var + BN_EPS)).astype(jnp.float32)
    bn_shift = (bn_beta + (b1 - bn_mean) * bn_scale).astype(jnp.float32)

    # Pad the first Linear's input features 310 -> 384 (zero rows contribute 0).
    w1p = jnp.zeros((IN_PAD, H1), jnp.float32).at[:IN_DIM, :].set(w1)
    # Pad the last Linear to a lane-dense (128-wide) output slab.
    w4p = jnp.zeros((H3, OUT_PAD), jnp.float32).at[:, :OUT_DIM].set(w4)
    b4p = jnp.zeros((1, OUT_PAD), jnp.float32).at[:, :OUT_DIM].set(b4)

    # Batch tiling: one "parallel" grid axis over batch tiles.
    bt = min(block_b, _round_up(B, 8))
    Bp = _round_up(B, bt)
    x = jnp.pad(x, ((0, Bp - B), (0, IN_PAD - IN_DIM)))

    # Cast MXU operands to bf16 (f32 accumulation inside the kernel).
    xb = x.astype(jnp.bfloat16)
    w1b = w1p.astype(jnp.bfloat16)
    w2b = w2.astype(jnp.bfloat16)
    w3b = w3.astype(jnp.bfloat16)
    w4b = w4p.astype(jnp.bfloat16)

    const = lambda i: (0, 0)
    out = pl.pallas_call(
        mlp_kernel,
        out_shape=jax.ShapeDtypeStruct((Bp, OUT_PAD), jnp.float32),
        grid_spec=pltpu.PrefetchScalarGridSpec(
            num_scalar_prefetch=0,
            grid=(Bp // bt,),
            in_specs=[
                pl.BlockSpec((bt, IN_PAD), lambda i: (i, 0)),   # x tile
                pl.BlockSpec((IN_PAD, H1), const),              # w1 (padded)
                pl.BlockSpec((1, H1), const),                   # bn scale
                pl.BlockSpec((1, H1), const),                   # bn shift (+b1)
                pl.BlockSpec((H1, H2), const),                  # w2
                pl.BlockSpec((1, H2), const),                   # b2
                pl.BlockSpec((H2, H3), const),                  # w3
                pl.BlockSpec((1, H3), const),                   # b3
                pl.BlockSpec((H3, OUT_PAD), const),             # w4 (padded)
                pl.BlockSpec((1, OUT_PAD), const),              # b4 (padded)
            ],
            out_specs=pl.BlockSpec((bt, OUT_PAD), lambda i: (i, 0)),
        ),
        compiler_params=pltpu.CompilerParams(
            dimension_semantics=("parallel",)),
    )(xb, w1b, bn_scale.reshape(1, H1), bn_shift.reshape(1, H1),
      w2b, b2.reshape(1, H2), w3b, b3.reshape(1, H3), w4b, b4p)

    return out[:B, :OUT_DIM]


def mlp_reference(x, params):
    """Pure-JAX reference mirroring the kernel's bf16/f32 numerics."""
    (w1, b1, bn_gamma, bn_beta, bn_mean, bn_var,
     w2, b2, w3, b3, w4, b4) = params
    bn_scale = bn_gamma / jnp.sqrt(bn_var + BN_EPS)
    bn_shift = bn_beta - bn_mean * bn_scale

    def dot(a, w):
        return jnp.dot(a.astype(jnp.bfloat16), w.astype(jnp.bfloat16),
                       preferred_element_type=jnp.float32)

    h = dot(x, w1) + b1
    h = _leaky_relu(h * bn_scale + bn_shift)
    h = _leaky_relu(dot(h, w2) + b2)
    h = _leaky_relu(dot(h, w3) + b3)
    return dot(h, w4) + b4


def init_params(key):
    """Deterministic synthetic parameters (PyTorch-Linear-like scaling)."""
    def linear(k, fan_in, fan_out):
        kw, kb = jax.random.split(k)
        bound = 1.0 / jnp.sqrt(fan_in)
        w = jax.random.uniform(kw, (fan_in, fan_out), jnp.float32, -bound, bound)
        b = jax.random.uniform(kb, (fan_out,), jnp.float32, -bound, bound)
        return w, b

    k1, k2, k3, k4, kbn = jax.random.split(key, 5)
    w1, b1 = linear(k1, IN_DIM, H1)
    w2, b2 = linear(k2, H1, H2)
    w3, b3 = linear(k3, H2, H3)
    w4, b4 = linear(k4, H3, OUT_DIM)

    kg, kb_, km, kv = jax.random.split(kbn, 4)
    bn_gamma = jax.random.uniform(kg, (H1,), jnp.float32, 0.5, 1.5)
    bn_beta = 0.1 * jax.random.normal(kb_, (H1,), jnp.float32)
    bn_mean = 0.1 * jax.random.normal(km, (H1,), jnp.float32)
    bn_var = jax.random.uniform(kv, (H1,), jnp.float32, 0.5, 1.5)

    return (w1, b1, bn_gamma, bn_beta, bn_mean, bn_var,
            w2, b2, w3, b3, w4, b4)


if __name__ == "__main__":
    B = 8  # small test batch

    key = jax.random.PRNGKey(0)
    kx, kp = jax.random.split(key)
    x = jax.random.normal(kx, (B, IN_DIM), jnp.float32)
    params = init_params(kp)

    out = mlp_forward(x, params)
    out = jax.block_until_ready(out)

    ref = mlp_reference(x, params)
    assert out.shape == (B, OUT_DIM), f"bad shape {out.shape}"
    assert jnp.allclose(out, ref, atol=1e-2, rtol=1e-2), "output mismatch"

    print("KERNEL_OK")
</pallas_src>

<mosaic_0001>
module attributes {stable_mosaic.version = 11 : i64} {
  func.func @mlp_kernel(%arg0: i32, %arg1: memref<8x384xbf16, #tpu.memory_space<vmem>>, %arg2: memref<384x256xbf16, #tpu.memory_space<vmem>>, %arg3: memref<1x256xf32, #tpu.memory_space<vmem>>, %arg4: memref<1x256xf32, #tpu.memory_space<vmem>>, %arg5: memref<256x128xbf16, #tpu.memory_space<vmem>>, %arg6: memref<1x128xf32, #tpu.memory_space<vmem>>, %arg7: memref<128x64xbf16, #tpu.memory_space<vmem>>, %arg8: memref<1x64xf32, #tpu.memory_space<vmem>>, %arg9: memref<64x128xbf16, #tpu.memory_space<vmem>>, %arg10: memref<1x128xf32, #tpu.memory_space<vmem>>, %arg11: memref<8x128xf32, #tpu.memory_space<vmem>>) attributes {dimension_semantics = [#tpu.dimension_semantics<parallel>], iteration_bounds = array<i64: 1>, scalar_prefetch = 0 : i64, scratch_operands = 0 : i64, tpu.core_type = #tpu.core_type<tc>, window_params = [{transform_indices = @transform_0, window_bounds = array<i64: 8, 384>}, {pipeline_mode = #tpu.pipeline_mode<synchronous>, transform_indices = @transform_1, window_bounds = array<i64: 384, 256>}, {pipeline_mode = #tpu.pipeline_mode<synchronous>, transform_indices = @transform_2, window_bounds = array<i64: 1, 256>}, {pipeline_mode = #tpu.pipeline_mode<synchronous>, transform_indices = @transform_3, window_bounds = array<i64: 1, 256>}, {pipeline_mode = #tpu.pipeline_mode<synchronous>, transform_indices = @transform_4, window_bounds = array<i64: 256, 128>}, {pipeline_mode = #tpu.pipeline_mode<synchronous>, transform_indices = @transform_5, window_bounds = array<i64: 1, 128>}, {pipeline_mode = #tpu.pipeline_mode<synchronous>, transform_indices = @transform_6, window_bounds = array<i64: 128, 64>}, {pipeline_mode = #tpu.pipeline_mode<synchronous>, transform_indices = @transform_7, window_bounds = array<i64: 1, 64>}, {pipeline_mode = #tpu.pipeline_mode<synchronous>, transform_indices = @transform_8, window_bounds = array<i64: 64, 128>}, {pipeline_mode = #tpu.pipeline_mode<synchronous>, transform_indices = @transform_9, window_bounds = array<i64: 1, 128>}, {transform_indices = @transform_10, window_bounds = array<i64: 8, 128>}]} {
    %c0 = arith.constant 0 : index
    %c0_0 = arith.constant 0 : index
    %0 = vector.load %arg1[%c0, %c0_0] : memref<8x384xbf16, #tpu.memory_space<vmem>>, vector<8x384xbf16>
    %c0_1 = arith.constant 0 : index
    %c0_2 = arith.constant 0 : index
    %1 = vector.load %arg2[%c0_1, %c0_2] : memref<384x256xbf16, #tpu.memory_space<vmem>>, vector<384x256xbf16>
    %cst = arith.constant dense<0.000000e+00> : vector<8x256xf32>
    %2 = tpu.matmul %0, %1, %cst {dimension_numbers = #tpu.dot_dimension_numbers<[1], [0], [0], [1], [0, 0, 1, 1], [], []>} : vector<8x384xbf16>, vector<384x256xbf16>, vector<8x256xf32> -> vector<8x256xf32>
    %c0_3 = arith.constant 0 : index
    %c0_4 = arith.constant 0 : index
    %3 = vector.load %arg3[%c0_3, %c0_4] : memref<1x256xf32, #tpu.memory_space<vmem>>, vector<1x256xf32>
    %4 = vector.broadcast %3 : vector<1x256xf32> to vector<8x256xf32>
    %5 = arith.mulf %2, %4 : vector<8x256xf32>
    %c0_5 = arith.constant 0 : index
    %c0_6 = arith.constant 0 : index
    %6 = vector.load %arg4[%c0_5, %c0_6] : memref<1x256xf32, #tpu.memory_space<vmem>>, vector<1x256xf32>
    %7 = vector.broadcast %6 : vector<1x256xf32> to vector<8x256xf32>
    %8 = arith.addf %5, %7 : vector<8x256xf32>
    %cst_7 = arith.constant 0.000000e+00 : f32
    %9 = vector.broadcast %cst_7 : f32 to vector<8x256xf32>
    %10 = arith.cmpf ogt, %8, %9 : vector<8x256xf32>
    %cst_8 = arith.constant 0.00999999977 : f32
    %11 = vector.broadcast %cst_8 : f32 to vector<8x256xf32>
    %12 = arith.mulf %11, %8 : vector<8x256xf32>
    %13 = arith.select %10, %8, %12 : vector<8x256xi1>, vector<8x256xf32>
    %14 = arith.truncf %13 : vector<8x256xf32> to vector<8x256xbf16>
    %c0_9 = arith.constant 0 : index
    %c0_10 = arith.constant 0 : index
    %15 = vector.load %arg5[%c0_9, %c0_10] : memref<256x128xbf16, #tpu.memory_space<vmem>>, vector<256x128xbf16>
    %cst_11 = arith.constant dense<0.000000e+00> : vector<8x128xf32>
    %16 = tpu.matmul %14, %15, %cst_11 {dimension_numbers = #tpu.dot_dimension_numbers<[1], [0], [0], [1], [0, 0, 1, 1], [], []>} : vector<8x256xbf16>, vector<256x128xbf16>, vector<8x128xf32> -> vector<8x128xf32>
    %c0_12 = arith.constant 0 : index
    %c0_13 = arith.constant 0 : index
    %17 = vector.load %arg6[%c0_12, %c0_13] : memref<1x128xf32, #tpu.memory_space<vmem>>, vector<1x128xf32>
    %18 = vector.broadcast %17 : vector<1x128xf32> to vector<8x128xf32>
    %19 = arith.addf %16, %18 : vector<8x128xf32>
    %cst_14 = arith.constant 0.000000e+00 : f32
    %20 = vector.broadcast %cst_14 : f32 to vector<8x128xf32>
    %21 = arith.cmpf ogt, %19, %20 : vector<8x128xf32>
    %cst_15 = arith.constant 0.00999999977 : f32
    %22 = vector.broadcast %cst_15 : f32 to vector<8x128xf32>
    %23 = arith.mulf %22, %19 : vector<8x128xf32>
    %24 = arith.select %21, %19, %23 : vector<8x128xi1>, vector<8x128xf32>
    %25 = arith.truncf %24 : vector<8x128xf32> to vector<8x128xbf16>
    %c0_16 = arith.constant 0 : index
    %c0_17 = arith.constant 0 : index
    %26 = vector.load %arg7[%c0_16, %c0_17] : memref<128x64xbf16, #tpu.memory_space<vmem>>, vector<128x64xbf16>
    %cst_18 = arith.constant dense<0.000000e+00> : vector<8x64xf32>
    %27 = tpu.matmul %25, %26, %cst_18 {dimension_numbers = #tpu.dot_dimension_numbers<[1], [0], [0], [1], [0, 0, 1, 1], [], []>} : vector<8x128xbf16>, vector<128x64xbf16>, vector<8x64xf32> -> vector<8x64xf32>
    %c0_19 = arith.constant 0 : index
    %c0_20 = arith.constant 0 : index
    %28 = vector.load %arg8[%c0_19, %c0_20] : memref<1x64xf32, #tpu.memory_space<vmem>>, vector<1x64xf32>
    %29 = vector.broadcast %28 : vector<1x64xf32> to vector<8x64xf32>
    %30 = arith.addf %27, %29 : vector<8x64xf32>
    %cst_21 = arith.constant 0.000000e+00 : f32
    %31 = vector.broadcast %cst_21 : f32 to vector<8x64xf32>
    %32 = arith.cmpf ogt, %30, %31 : vector<8x64xf32>
    %cst_22 = arith.constant 0.00999999977 : f32
    %33 = vector.broadcast %cst_22 : f32 to vector<8x64xf32>
    %34 = arith.mulf %33, %30 : vector<8x64xf32>
    %35 = arith.select %32, %30, %34 : vector<8x64xi1>, vector<8x64xf32>
    %36 = arith.truncf %35 : vector<8x64xf32> to vector<8x64xbf16>
    %c0_23 = arith.constant 0 : index
    %c0_24 = arith.constant 0 : index
    %37 = vector.load %arg9[%c0_23, %c0_24] : memref<64x128xbf16, #tpu.memory_space<vmem>>, vector<64x128xbf16>
    %cst_25 = arith.constant dense<0.000000e+00> : vector<8x128xf32>
    %38 = tpu.matmul %36, %37, %cst_25 {dimension_numbers = #tpu.dot_dimension_numbers<[1], [0], [0], [1], [0, 0, 1, 1], [], []>} : vector<8x64xbf16>, vector<64x128xbf16>, vector<8x128xf32> -> vector<8x128xf32>
    %c0_26 = arith.constant 0 : index
    %c0_27 = arith.constant 0 : index
    %39 = vector.load %arg10[%c0_26, %c0_27] : memref<1x128xf32, #tpu.memory_space<vmem>>, vector<1x128xf32>
    %40 = vector.broadcast %39 : vector<1x128xf32> to vector<8x128xf32>
    %41 = arith.addf %38, %40 : vector<8x128xf32>
    %c0_28 = arith.constant 0 : index
    %c0_29 = arith.constant 0 : index
    %42 = vector.load %arg11[%c0_28, %c0_29] : memref<8x128xf32, #tpu.memory_space<vmem>>, vector<8x128xf32>
    tpu.vector_store %arg11[%c0_28, %c0_29], %41 {strides = array<i32>} : memref<8x128xf32, #tpu.memory_space<vmem>>, vector<8x128xf32>,
    return
  }
  func.func @transform_0(%arg0: i32) -> (i32, i32) {
    %c0_i32 = arith.constant 0 : i32
    %c0_i32_0 = arith.constant 0 : i32
    return %arg0, %c0_i32 : i32, i32
  }
  func.func @transform_1(%arg0: i32) -> (i32, i32) {
    %c0_i32 = arith.constant 0 : i32
    %c0_i32_0 = arith.constant 0 : i32
    %c0_i32_1 = arith.constant 0 : i32
    return %c0_i32, %c0_i32_0 : i32, i32
  }
  func.func @transform_2(%arg0: i32) -> (i32, i32) {
    %c0_i32 = arith.constant 0 : i32
    %c0_i32_0 = arith.constant 0 : i32
    %c0_i32_1 = arith.constant 0 : i32
    return %c0_i32, %c0_i32_0 : i32, i32
  }
  func.func @transform_3(%arg0: i32) -> (i32, i32) {
    %c0_i32 = arith.constant 0 : i32
    %c0_i32_0 = arith.constant 0 : i32
    %c0_i32_1 = arith.constant 0 : i32
    return %c0_i32, %c0_i32_0 : i32, i32
  }
  func.func @transform_4(%arg0: i32) -> (i32, i32) {
    %c0_i32 = arith.constant 0 : i32
    %c0_i32_0 = arith.constant 0 : i32
    %c0_i32_1 = arith.constant 0 : i32
    return %c0_i32, %c0_i32_0 : i32, i32
  }
  func.func @transform_5(%arg0: i32) -> (i32, i32) {
    %c0_i32 = arith.constant 0 : i32
    %c0_i32_0 = arith.constant 0 : i32
    %c0_i32_1 = arith.constant 0 : i32
    return %c0_i32, %c0_i32_0 : i32, i32
  }
  func.func @transform_6(%arg0: i32) -> (i32, i32) {
    %c0_i32 = arith.constant 0 : i32
    %c0_i32_0 = arith.constant 0 : i32
    %c0_i32_1 = arith.constant 0 : i32
    return %c0_i32, %c0_i32_0 : i32, i32
  }
  func.func @transform_7(%arg0: i32) -> (i32, i32) {
    %c0_i32 = arith.constant 0 : i32
    %c0_i32_0 = arith.constant 0 : i32
    %c0_i32_1 = arith.constant 0 : i32
    return %c0_i32, %c0_i32_0 : i32, i32
  }
  func.func @transform_8(%arg0: i32) -> (i32, i32) {
    %c0_i32 = arith.constant 0 : i32
    %c0_i32_0 = arith.constant 0 : i32
    %c0_i32_1 = arith.constant 0 : i32
    return %c0_i32, %c0_i32_0 : i32, i32
  }
  func.func @transform_9(%arg0: i32) -> (i32, i32) {
    %c0_i32 = arith.constant 0 : i32
    %c0_i32_0 = arith.constant 0 : i32
    %c0_i32_1 = arith.constant 0 : i32
    return %c0_i32, %c0_i32_0 : i32, i32
  }
  func.func @transform_10(%arg0: i32) -> (i32, i32) {
    %c0_i32 = arith.constant 0 : i32
    %c0_i32_0 = arith.constant 0 : i32
    return %arg0, %c0_i32 : i32, i32
  }
}

</mosaic_0001>

<bundles_post_ra>
// kernel: mlp_forward.1
= control target key start
LH: loop header
LB: loop body
LE: loop exit
PB: predicated region body
PF: predicated region fallthrough
CT: control target
= control target key end

     0   :  { %v1098_v49 = vmov 0   ;;  %vm1100_vm2 = vmmov 0   ;;  %vm788_vm5 = vcmask 523264   ;;  %s1430_s1 = inlined_call_operand.vmem [shape: bf16[384,256], index: 1, kind: input, shape index: {}]   ;;  %s1431_s0 = inlined_call_operand.vmem [shape: bf16[8,384], index: 0, kind: input, shape index: {}]   ;;  %s1432_s4 = inlined_call_operand.vmem [shape: bf16[256,128], index: 4, kind: input, shape index: {}]   ;;  %s1433_s6 = inlined_call_operand.vmem [shape: bf16[128,64], index: 6, kind: input, shape index: {}]   ;;  %s1434_s2 = inlined_call_operand.vmem [shape: f32[1,256], index: 2, kind: input, shape index: {}]   ;;  %s1435_s3 = inlined_call_operand.vmem [shape: f32[1,256], index: 3, kind: input, shape index: {}]   ;;  %s1436_s8 = inlined_call_operand.vmem [shape: bf16[64,128], index: 8, kind: input, shape index: {}]   ;;  %s1437_s5 = inlined_call_operand.vmem [shape: f32[1,128], index: 5, kind: input, shape index: {}]   ;;  %s1438_s7 = inlined_call_operand.vmem [shape: f32[1,64], index: 7, kind: input, shape index: {}]   ;;  %s1439_s9 = inlined_call_operand.vmem [shape: f32[1,128], index: 9, kind: input, shape index: {}]   ;;  %s1440_s10 = inlined_call_operand.vmem [shape: f32[8,128], index: 10, kind: output, shape index: {}]  }
   0x1   :  { %v995_v0 = vld [vmem:[%s1430_s1 + $0x4] ss:$8 sps:$4 sm:$0xff]   ;;  %v997_v1 = vld [vmem:[%s1430_s1] ss:$8 sps:$4 sm:$0xff]   ;;  %v998_v2 = vld [vmem:[%s1430_s1 + $0x14] ss:$8 sps:$4 sm:$0xff]  }
   0x2   :  { %337 = vmatprep.subr.bf16.mxu0 %v995_v0  ;;  %v1000_v3 = vld [vmem:[%s1430_s1 + $0x10] ss:$8 sps:$4 sm:$0xff]   ;;  %v1001_v4 = vld [vmem:[%s1430_s1 + $0x24] ss:$8 sps:$4 sm:$0xff]   ;;  %v1003_v5 = vld [vmem:[%s1430_s1 + $0x20] ss:$8 sps:$4 sm:$0xff]  }
   0x3   :  { %338 = vmatpush1.bf16.msra.mxu0 %v997_v1  ;;  %v1004_v6 = vld [vmem:[%s1430_s1 + $0x34] ss:$8 sps:$4 sm:$0xff]   ;;  %v1006_v7 = vld [vmem:[%s1430_s1 + $0x30] ss:$8 sps:$4 sm:$0xff]   ;;  %v1007_v8 = vld [vmem:[%s1430_s1 + $0x44] ss:$8 sps:$4 sm:$0xff]  }
   0x4   :  { %339 = vmatprep.subr.bf16.mxu0 %v998_v2  ;;  %v1009_v9 = vld [vmem:[%s1430_s1 + $0x40] ss:$8 sps:$4 sm:$0xff]   ;;  %v1010_v10 = vld [vmem:[%s1430_s1 + $0x54] ss:$8 sps:$4 sm:$0xff]   ;;  %v1012_v11 = vld [vmem:[%s1430_s1 + $0x50] ss:$8 sps:$4 sm:$0xff]  }
   0x5   :  { %v1013_v12 = vld [vmem:[%s1430_s1 + $0x64] ss:$8 sps:$4 sm:$0xff]   ;;  %v1015_v15 = vld [vmem:[%s1430_s1 + $0x60] ss:$8 sps:$4 sm:$0xff]   ;;  %v1016_v16 = vld [vmem:[%s1430_s1 + $0x74] ss:$8 sps:$4 sm:$0xff]  }
   0x6   :  { %v1198_v13 = vld [vmem:[%s1431_s0] sm:$0xff]  ;;  %v1018_v17 = vld [vmem:[%s1430_s1 + $0x70] ss:$8 sps:$4 sm:$0xff]   ;;  %v1022_v20 = vld [vmem:[%s1430_s1 + $0x94] ss:$8 sps:$4 sm:$0xff]  }
   0x7   :  { %340 = vmatpush1.bf16.msra.mxu0 %v1000_v3  ;;  %v838_v14 = vcombine.high %v1198_v13, %v1198_v13  ;;  %v1019_v18 = vld [vmem:[%s1430_s1 + $0x84] ss:$8 sps:$4 sm:$0xff]   ;;  %v1021_v19 = vld [vmem:[%s1430_s1 + $0x80] ss:$8 sps:$4 sm:$0xff]   ;;  %v1024_v21 = vld [vmem:[%s1430_s1 + $0x90] ss:$8 sps:$4 sm:$0xff]   ;;  %v837_v45 = vcombine.low %v1198_v13, %v1198_v13 }
   0x8   :  { %341 = vmatprep.subr.bf16.mxu0 %v1001_v4  ;;  %v1070_v22 = vld [vmem:[%s1432_s4 + $0x40] sm:$0xff]   ;;  %v1072_v25 = vld [vmem:[%s1432_s4 + $0x48] sm:$0xff]   ;;  %v1074_v27 = vld [vmem:[%s1432_s4 + $0x50] sm:$0xff]  }
   0x9   :  { %369 = vmatprep.mubr.bf16.mxu0 %v838_v14  ;;  %v1025_v23 = vld [vmem:[%s1430_s1 + $0xa4] ss:$8 sps:$4 sm:$0xff]   ;;  %920 = vmatprep.subr.bf16.mxu1 %v1070_v22  ;;  %v1027_v28 = vld [vmem:[%s1430_s1 + $0xa0] ss:$8 sps:$4 sm:$0xff]   ;;  %v1028_v29 = vld [vmem:[%s1430_s1 + $0xb4] ss:$8 sps:$4 sm:$0xff]  }
   0xa   :  { %v1071_v24 = vld [vmem:[%s1432_s4] sm:$0xff]   ;;  %v1073_v26 = vld [vmem:[%s1432_s4 + $0x8] sm:$0xff]   ;;  %v1075_v30 = vld [vmem:[%s1432_s4 + $0x10] sm:$0xff]  }
   0xb   :  { %342 = vmatpush1.bf16.msra.mxu0 %v1003_v5  ;;  %921 = vmatpush3.bf16.msra.mxu1 %v1071_v24  ;;  %v1030_v31 = vld [vmem:[%s1430_s1 + $0xb0] ss:$8 sps:$4 sm:$0xff]   ;;  %v1031_v33 = vld [vmem:[%s1430_s1 + $0xc4] ss:$8 sps:$4 sm:$0xff]   ;;  %v1033_v36 = vld [vmem:[%s1430_s1 + $0xc0] ss:$8 sps:$4 sm:$0xff]  }
   0xc   :  { %343 = vmatprep.subr.bf16.mxu0 %v1004_v6  ;;  %922 = vmatprep.subr.bf16.mxu1 %v1072_v25  ;;  %v1076_v32 = vld [vmem:[%s1432_s4 + $0x58] sm:$0xff]   ;;  %v1078_v35 = vld [vmem:[%s1432_s4 + $0x60] sm:$0xff]   ;;  %v1045_v62 = vld [vmem:[%s1431_s0 + $0x8] ss:$0 sps:$4 sm:$0xff]   ;;  %v1099_v5 = vmov 0.0   ;;  %v421_v6 = vlaneseq }
   0xd   :  { %v1077_v34 = vld [vmem:[%s1432_s4 + $0x18] sm:$0xff]   ;;  %v1079_v38 = vld [vmem:[%s1432_s4 + $0x20] sm:$0xff]   ;;  %v1080_v63 = vld [vmem:[%s1432_s4 + $0x68] sm:$0xff]  }
   0xe   :  { %v1034_v37 = vld [vmem:[%s1430_s1 + $0xd4] ss:$8 sps:$4 sm:$0xff]   ;;  %v1036_v39 = vld [vmem:[%s1430_s1 + $0xd0] ss:$8 sps:$4 sm:$0xff]   ;;  %v1037_v40 = vld [vmem:[%s1430_s1 + $0xe4] ss:$8 sps:$4 sm:$0xff]  }
   0xf   :  { %344 = vmatpush1.bf16.msra.mxu0 %v1006_v7  ;;  %923 = vmatpush3.bf16.msra.mxu1 %v1073_v26  ;;  %v1039_v41 = vld [vmem:[%s1430_s1 + $0xe0] ss:$8 sps:$4 sm:$0xff]   ;;  %v1040_v42 = vld [vmem:[%s1430_s1 + $0xf4] ss:$8 sps:$4 sm:$0xff]   ;;  %v1042_v43 = vld [vmem:[%s1430_s1 + $0xf0] ss:$8 sps:$4 sm:$0xff]  }
  0x10   :  { %345 = vmatprep.subr.bf16.mxu0 %v1007_v8  ;;  %924 = vmatprep.subr.bf16.mxu1 %v1074_v27  ;;  %v1048_v44 = vld [vmem:[%s1430_s1 + $0x104] ss:$8 sps:$4 sm:$0xff]   ;;  %v1046_v46 = vld [vmem:[%s1430_s1 + $0x100] ss:$8 sps:$4 sm:$0xff]   ;;  %v1051_v47 = vld [vmem:[%s1430_s1 + $0x114] ss:$8 sps:$4 sm:$0xff]  }
  0x11   :  { %v1049_v48 = vld [vmem:[%s1430_s1 + $0x110] ss:$8 sps:$4 sm:$0xff]   ;;  %v1054_v50 = vld [vmem:[%s1430_s1 + $0x124] ss:$8 sps:$4 sm:$0xff]   ;;  %v1052_v51 = vld [vmem:[%s1430_s1 + $0x120] ss:$8 sps:$4 sm:$0xff]  }
  0x12   :  { %v1057_v52 = vld [vmem:[%s1430_s1 + $0x134] ss:$8 sps:$4 sm:$0xff]   ;;  %v1055_v53 = vld [vmem:[%s1430_s1 + $0x130] ss:$8 sps:$4 sm:$0xff]   ;;  %v1060_v54 = vld [vmem:[%s1430_s1 + $0x144] ss:$8 sps:$4 sm:$0xff]  }
  0x13   :  { %346 = vmatpush1.bf16.msra.mxu0 %v1009_v9  ;;  %925 = vmatpush3.bf16.msra.mxu1 %v1075_v30  ;;  %v1058_v55 = vld [vmem:[%s1430_s1 + $0x140] ss:$8 sps:$4 sm:$0xff]   ;;  %v1063_v56 = vld [vmem:[%s1430_s1 + $0x154] ss:$8 sps:$4 sm:$0xff]   ;;  %v1061_v57 = vld [vmem:[%s1430_s1 + $0x150] ss:$8 sps:$4 sm:$0xff]  }
  0x14   :  { %347 = vmatprep.subr.bf16.mxu0 %v1010_v10  ;;  %926 = vmatprep.subr.bf16.mxu1 %v1076_v32  ;;  %v1066_v58 = vld [vmem:[%s1430_s1 + $0x164] ss:$8 sps:$4 sm:$0xff]   ;;  %v1064_v59 = vld [vmem:[%s1430_s1 + $0x160] ss:$8 sps:$4 sm:$0xff]   ;;  %v1069_v60 = vld [vmem:[%s1430_s1 + $0x174] ss:$8 sps:$4 sm:$0xff]  }
  0x15   :  { %v1067_v61 = vld [vmem:[%s1430_s1 + $0x170] ss:$8 sps:$4 sm:$0xff]   ;;  %v1081_v0 = vld [vmem:[%s1432_s4 + $0x28] sm:$0xff]   ;;  %v422_v7 = vshrl.u32 %v421_v6, 7  ;;  %v419_v9 = vld [vmem:[%s1434_s2] sm:$0x3] }
  0x16   :  { %v1082_v1 = vld [vmem:[%s1432_s4 + $0x70] sm:$0xff]   ;;  %v1084_v3 = vld [vmem:[%s1432_s4 + $0x78] sm:$0xff]  }
  0x17   :  { %348 = vmatpush1.bf16.msra.mxu0 %v1012_v11  ;;  %927 = vmatpush3.bf16.msra.mxu1 %v1077_v34  ;;  %v1083_v2 = vld [vmem:[%s1432_s4 + $0x30] sm:$0xff]   ;;  %v1085_v4 = vld [vmem:[%s1432_s4 + $0x38] sm:$0xff]   ;;  %v423_v8 = vsub.s32 0, %v422_v7  ;;  %v427_v10 = vsub.s32 1, %v422_v7  ;;  %v433_v11 = vld [vmem:[%s1435_s3] sm:$0x3] }
  0x18   :  { %349 = vmatprep.subr.bf16.mxu0 %v1013_v12  ;;  %928 = vmatprep.subr.bf16.mxu1 %v1078_v35  ;;  %v1088_v32 = vld [vmem:[%s1433_s6 + $0x10] sm:$0xff]   ;;  %v1090_v34 = vld [vmem:[%s1433_s6 + $0x20] sm:$0xff]   ;;  %v1091_v35 = vld [vmem:[%s1433_s6 + $0x28] sm:$0xff]  }
  0x19   :  { %v424_v12 = vrot.slane %v419_v9, %v423_v8  ;;  %v428_v13 = vrot.slane %v419_v9, %v427_v10  ;;  %v438_v14 = vrot.slane %v433_v11, %v423_v8 }
  0x1b   :  { %350 = vmatpush1.bf16.msra.mxu0 %v1015_v15  ;;  %929 = vmatpush3.bf16.msra.mxu1 %v1079_v38 }
  0x1c   :  { %351 = vmatprep.subr.bf16.mxu0 %v1016_v16  ;;  %930 = vmatprep.subr.bf16.mxu1 %v1080_v63  ;;  %v442_v16 = vrot.slane %v433_v11, %v427_v10 }
  0x1f   :  { %352 = vmatpush1.bf16.msra.mxu0 %v1018_v17  ;;  %931 = vmatpush3.bf16.msra.mxu1 %v1081_v0 }
  0x20   :  { %353 = vmatprep.subr.bf16.mxu0 %v1019_v18  ;;  %932 = vmatprep.subr.bf16.mxu1 %v1082_v1 }
  0x23   :  { %354 = vmatpush1.bf16.msra.mxu0 %v1021_v19  ;;  %933 = vmatpush3.bf16.msra.mxu1 %v1083_v2 }
  0x24   :  { %355 = vmatprep.subr.bf16.mxu0 %v1022_v20  ;;  %934 = vmatprep.subr.bf16.mxu1 %v1084_v3 }
  0x27   :  { %356 = vmatpush1.bf16.msra.mxu0 %v1024_v21  ;;  %935 = vmatpush3.bf16.msra.mxu1 %v1085_v4 }
  0x28   :  { %357 = vmatprep.subr.bf16.mxu0 %v1025_v23  ;;  %956 = vmatprep.subr.bf16.mxu1 %v1099_v5 }
  0x2b   :  { %358 = vmatpush1.bf16.msra.mxu0 %v1027_v28 }
  0x2c   :  { %359 = vmatprep.subr.bf16.mxu0 %v1028_v29  ;;  %v1086_v29 = vld [vmem:[%s1433_s6] sm:$0xff]  }
  0x2f   :  { %360 = vmatpush1.bf16.msra.mxu0 %v1030_v31  ;;  %v1087_v31 = vld [vmem:[%s1433_s6 + $0x8] sm:$0xff]  }
  0x30   :  { %361 = vmatprep.subr.bf16.mxu0 %v1031_v33  ;;  %v1089_v33 = vld [vmem:[%s1433_s6 + $0x18] sm:$0xff]  }
  0x33   :  { %362 = vmatpush1.bf16.msra.mxu0 %v1033_v36  ;;  %v1092_v36 = vld [vmem:[%s1433_s6 + $0x30] sm:$0xff]  }
  0x34   :  { %363 = vmatprep.subr.bf16.mxu0 %v1034_v37  ;;  %v1093_v37 = vld [vmem:[%s1433_s6 + $0x38] sm:$0xff]  }
  0x37   :  { %364 = vmatpush1.bf16.msra.mxu0 %v1036_v39  ;;  %v888_v39 = vld [vmem:[%s1437_s5] ss:$0 sm:$0xff] }
  0x38   :  { %365 = vmatprep.subr.bf16.mxu0 %v1037_v40 }
  0x3b   :  { %366 = vmatpush1.bf16.msra.mxu0 %v1039_v41 }
  0x3c   :  { %367 = vmatprep.subr.bf16.mxu0 %v1040_v42 }
  0x3f   :  { %368 = vmatpush1.bf16.msra.mxu0 %v1042_v43 }
  0x40   :  { %378 = vmatprep.subr.bf16.mxu0 %v1048_v44 }
  0x42   :  { %370 = vmatmul.mubr.bf16.vlgmr.msra.gmra.mrb[0].mxu0 %v837_v45 }
  0x43   :  { %379 = vmatpush1.bf16.msra.mxu0 %v1046_v46  ;;  %410 = vmatprep.mubr.bf16.mxu0 %v1098_v49  ;;  %v1095_v49 = vld [vmem:[%s1436_s8 + $0x8] sm:$0xff]  }
  0x44   :  { %380 = vmatprep.subr.bf16.mxu0 %v1051_v47  ;;  %v1094_v47 = vld [vmem:[%s1436_s8] sm:$0xff]  }
  0x47   :  { %381 = vmatpush1.bf16.msra.mxu0 %v1049_v48 }
  0x48   :  { %382 = vmatprep.subr.bf16.mxu0 %v1054_v50  ;;  %v1096_v50 = vld [vmem:[%s1436_s8 + $0x10] sm:$0xff]  }
  0x4b   :  { %383 = vmatpush1.bf16.msra.mxu0 %v1052_v51  ;;  %v1097_v51 = vld [vmem:[%s1436_s8 + $0x18] sm:$0xff]  }
  0x4c   :  { %384 = vmatprep.subr.bf16.mxu0 %v1057_v52  ;;  %v905_v52 = vld [vmem:[%s1438_s7] ss:$0 sm:$0xff] }
  0x4f   :  { %385 = vmatpush1.bf16.msra.mxu0 %v1055_v53 }
  0x50   :  { %386 = vmatprep.subr.bf16.mxu0 %v1060_v54 }
  0x53   :  { %387 = vmatpush1.bf16.msra.mxu0 %v1058_v55 }
  0x54   :  { %388 = vmatprep.subr.bf16.mxu0 %v1063_v56 }
  0x57   :  { %389 = vmatpush1.bf16.msra.mxu0 %v1061_v57 }
  0x58   :  { %390 = vmatprep.subr.bf16.mxu0 %v1066_v58 }
  0x5b   :  { %391 = vmatpush1.bf16.msra.mxu0 %v1064_v59 }
  0x5c   :  { %392 = vmatprep.subr.bf16.mxu0 %v1069_v60 }
  0x5f   :  { %393 = vmatpush1.bf16.msra.mxu0 %v1067_v61  ;;  %v914_v61 = vld [vmem:[%s1439_s9] ss:$0 sm:$0xff] }
  0x62   :  { %411 = vmatmul.mubr.bf16.vlgmr.msra.gmra.mrb[0].mxu0 %v1045_v62 }
 0x135   :  { %v412_v15 = vpop.f32.mrb[0].mxu0 }
 0x136   :  { %v431_v17 = vmul.f32 %v424_v12, %v412_v15  ;;  %v414_v18 = vpop.f32.mrb[1].mxu0 }
 0x137   :  { %v432_v19 = vmul.f32 %v428_v13, %v414_v18  ;;  %v416_v20 = vpop.f32.mrb[2].mxu0 }
 0x138   :  { %v445_v21 = vadd.f32 %v438_v14, %v431_v17  ;;  %v417_v22 = vpop.f32.mrb[3].mxu0 }
 0x139   :  { %v446_v23 = vadd.f32 %v442_v16, %v432_v19 }
 0x13a   :  { %v449_v24 = vmul.f32 0.01, %v445_v21  ;;  %vm447_vm0 = vcmp.gt.f32.partialorder %v445_v21, 0.0 }
 0x13b   :  { %vm448_vm1 = vcmp.gt.f32.partialorder %v446_v23, 0.0  ;;  %v450_v25 = vmul.f32 0.01, %v446_v23 }
 0x13c   :  { %v451_v26 = vsel %vm447_vm0, %v445_v21, %v449_v24 }
 0x13d   :  { %v452_v27 = vsel %vm448_vm1, %v446_v23, %v450_v25  ;;  %v453_v30 = vpack.c.bf16 %v451_v26, %v451_v26 }
 0x13e   :  { %v454_v28 = vpack.c.bf16 %v452_v27, %v452_v27 }
 0x140   :  { %622 = vmatprep.mubr.bf16.mxu1 %v454_v28 }
 0x141   :  { %623 = vmatmul.mubr.bf16.vlgmr.msra.gmra.mrb[0].mxu1 %v453_v30 }
 0x142   :  { %957 = vmatpush3.bf16.msra.mxu1 %v1086_v29  ;;  %972 = vmatprep.mubr.msk.bf16.mxu1 %vm1100_vm2, %v1099_v5 }
 0x143   :  { %958 = vmatprep.subr.bf16.mxu1 %v1099_v5 }
 0x146   :  { %959 = vmatpush3.bf16.msra.mxu1 %v1087_v31 }
 0x147   :  { %960 = vmatprep.subr.bf16.mxu1 %v1099_v5 }
 0x14a   :  { %961 = vmatpush3.bf16.msra.mxu1 %v1088_v32 }
 0x14b   :  { %962 = vmatprep.subr.bf16.mxu1 %v1099_v5 }
 0x14e   :  { %963 = vmatpush3.bf16.msra.mxu1 %v1089_v33 }
 0x14f   :  { %964 = vmatprep.subr.bf16.mxu1 %v1099_v5 }
 0x152   :  { %965 = vmatpush3.bf16.msra.mxu1 %v1090_v34 }
 0x153   :  { %966 = vmatprep.subr.bf16.mxu1 %v1099_v5 }
 0x156   :  { %967 = vmatpush3.bf16.msra.mxu1 %v1091_v35 }
 0x157   :  { %968 = vmatprep.subr.bf16.mxu1 %v1099_v5 }
 0x15a   :  { %969 = vmatpush3.bf16.msra.mxu1 %v1092_v36 }
 0x15b   :  { %970 = vmatprep.subr.bf16.mxu1 %v1099_v5 }
 0x15e   :  { %971 = vmatpush3.bf16.msra.mxu1 %v1093_v37 }
 0x15f   :  { %976 = vmatprep.subr.bf16.mxu1 %v1099_v5 }
 0x214   :  { %v936_v38 = vpop.f32.mrb[0].mxu1 }
 0x215   :  { %v937_v40 = vpop.f32.mrb[1].mxu1 }
 0x216   :  { %v938_v41 = vadd.f32 %v937_v40, %v936_v38  ;;  %v939_v42 = vpop.f32.mrb[2].mxu1 }
 0x217   :  { %v940_v43 = vpop.f32.mrb[3].mxu1 }
 0x218   :  { %v625_v44 = vadd.f32 %v938_v41, %v888_v39 }
 0x21a   :  { %vm630_vm3 = vcmp.gt.f32.partialorder %v625_v44, 0.0  ;;  %v631_v45 = vmul.f32 0.01, %v625_v44 }
 0x21c   :  { %v632_v46 = vsel %vm630_vm3, %v625_v44, %v631_v45 }
 0x21d   :  { %v633_v48 = vpack.c.bf16 %v632_v46, %v632_v46 }
 0x21f   :  { %973 = vmatmul.mubr.bf16.vlgmr.msra.gmra.mrb[4].mxu1 %v633_v48 }
 0x220   :  { %977 = vmatpush3.bf16.msra.mxu1 %v1094_v47  ;;  %984 = vmatprep.mubr.msk.bf16.mxu1 %vm1100_vm2, %v1099_v5 }
 0x221   :  { %978 = vmatprep.subr.bf16.mxu1 %v1099_v5 }
 0x224   :  { %979 = vmatpush3.bf16.msra.mxu1 %v1095_v49 }
 0x225   :  { %980 = vmatprep.subr.bf16.mxu1 %v1099_v5 }
 0x228   :  { %981 = vmatpush3.bf16.msra.mxu1 %v1096_v50 }
 0x229   :  { %982 = vmatprep.subr.bf16.mxu1 %v1099_v5 }
 0x22c   :  { %983 = vmatpush3.bf16.msra.mxu1 %v1097_v51 }
 0x2f2   :  { %v739_v53 = vpop.f32.mrb[4].mxu1 }
 0x2f3   :  { %v740_v54 = vadd.f32 %v905_v52, %v739_v53  ;;  %v974_v55 = vpop.f32.mrb[5].mxu1 }
 0x2f4   :  { %v742_v56 = vpop.f32.mrb[6].mxu1 }
 0x2f5   :  { %vm745_vm4 = vcmp.gt.f32.partialorder %v740_v54, 0.0  ;;  %v746_v57 = vmul.f32 0.01, %v740_v54  ;;  %v975_v58 = vpop.f32.mrb[7].mxu1 }
 0x2f7   :  { %v747_v59 = vsel %vm745_vm4, %v740_v54, %v746_v57 }
 0x2f8   :  { %v748_v60 = vpack.c.bf16 %v747_v59, %v747_v59 }
 0x2fa   :  { %985 = vmatmul.mubr.msk.bf16.vlgmr.msra.gmra.mrb[8].mxu1 %vm788_vm5, %v748_v60 }
 0x3cd   :  { %v826_v62 = vpop.f32.mrb[8].mxu1 }
 0x3ce   :  { %v827_v63 = vadd.f32 %v914_v61, %v826_v62  ;;  %v986_v0 = vpop.f32.mrb[9].mxu1 }
 0x3cf   :  { %v829_v1 = vpop.f32.mrb[10].mxu1 }
 0x3d0   :  { %832 = vst [vmem:[%s1440_s10] sm:$0xff] %v827_v63  ;;  %v987_v2 = vpop.f32.mrb[11].mxu1 }

</bundles_post_ra>
